<compile_context>
chip_gen: v5e
topology: v5e:2x2
jax: 0.10.0
libtpu: 0.0.40
codegen_flags: <defaults>
</compile_context>

<pallas_src>
import jax
import jax.numpy as jnp
from jax.experimental import pallas as pl
from jax.experimental.pallas import tpu as pltpu  # noqa: F401  (TPU backend)


def _gcn_fused_kernel(x_ref, adj_ref, w1_ref, b1_ref, w2_ref, b2_ref, o_ref):
    adj = adj_ref[...]

    # ---- Layer 1: relu(adj @ (x @ W1) + b1), reassociated as ((adj @ x) @ W1) ----
    t1 = jnp.dot(adj, x_ref[...], preferred_element_type=jnp.float32)      # [N, Fin]
    h = jnp.dot(t1, w1_ref[...], preferred_element_type=jnp.float32)       # [N, NHID]
    h = jnp.maximum(h + b1_ref[...], 0.0)

    # Dropout in eval mode == identity.

    # ---- Layer 2: adj @ (h @ W2) + b2, reassociated as ((adj @ h) @ W2) ----
    t2 = jnp.dot(adj, h, preferred_element_type=jnp.float32)               # [N, NHID]
    out = jnp.dot(t2, w2_ref[...], preferred_element_type=jnp.float32)     # [N, NOUT]
    out = out + b2_ref[...]

    o_ref[...] = out.astype(o_ref.dtype)


def gcn_forward(params, x, adj):
    """Fused two-layer GCN forward: relu(gc1(x, adj)) -> gc2(., adj)."""
    N, Fin = x.shape
    NHID = params["w1"].shape[1]
    NOUT = params["w2"].shape[1]

    b1 = params["b1"].reshape(1, NHID)
    b2 = params["b2"].reshape(1, NOUT)

    # Advisory cost hint for XLA's scheduler.
    flops = 2 * (N * N * Fin + N * Fin * NHID + N * N * NHID + N * NHID * NOUT)
    bytes_accessed = 4 * (
        N * Fin + N * N + Fin * NHID + NHID + NHID * NOUT + NOUT + N * NOUT
    )

    return pl.pallas_call(
        _gcn_fused_kernel,
        out_shape=jax.ShapeDtypeStruct((N, NOUT), x.dtype),
        grid=(),
        in_specs=[
            pl.BlockSpec((N, Fin), lambda: (0, 0)),      # x
            pl.BlockSpec((N, N), lambda: (0, 0)),        # adj
            pl.BlockSpec((Fin, NHID), lambda: (0, 0)),   # W1
            pl.BlockSpec((1, NHID), lambda: (0, 0)),     # b1
            pl.BlockSpec((NHID, NOUT), lambda: (0, 0)),  # W2
            pl.BlockSpec((1, NOUT), lambda: (0, 0)),     # b2
        ],
        out_specs=pl.BlockSpec((N, NOUT), lambda: (0, 0)),
        cost_estimate=pl.CostEstimate(
            flops=flops, transcendentals=0, bytes_accessed=bytes_accessed
        ),
    )(x, adj, params["w1"], b1, params["w2"], b2)


def kaiming_uniform(key, fan_in, shape, dtype=jnp.float32):
    # nn.init.kaiming_uniform_ default: a=0, fan_in mode, gain=sqrt(2)
    # bound = gain * sqrt(3 / fan_in)
    bound = jnp.sqrt(2.0) * jnp.sqrt(3.0 / fan_in)
    return jax.random.uniform(key, shape, dtype, minval=-bound, maxval=bound)


def init_gcn_params(key, nfeat, nhid, nout=768):
    k1, k2 = jax.random.split(key)
    w1 = kaiming_uniform(k1, nfeat, (nfeat, nhid))
    b1 = jnp.zeros((nhid,), jnp.float32)
    w2 = kaiming_uniform(k2, nhid, (nhid, nout))
    b2 = jnp.zeros((nout,), jnp.float32)
    return {"w1": w1, "b1": b1, "w2": w2, "b2": b2}


if __name__ == "__main__":
    key = jax.random.PRNGKey(0)
    k_x, k_adj, k_p = jax.random.split(key, 3)

    N = 16       # number of graph nodes
    NFEAT = 32   # input feature dim
    NHID = 64    # hidden dim
    NOUT = 768   # fixed by the module (gc2 output)

    x = jax.random.normal(k_x, (N, NFEAT), jnp.float32)
    # Symmetric row-normalized-ish adjacency (dense), deterministic.
    a = jax.random.uniform(k_adj, (N, N), jnp.float32)
    adj = (a + a.T) / 2.0
    adj = adj / jnp.sum(adj, axis=-1, keepdims=True)

    params = init_gcn_params(k_p, NFEAT, NHID, NOUT)

    out = gcn_forward(params, x, adj)
    out = jax.block_until_ready(out)

    # Reference check in plain JAX (same math as the PyTorch module).
    ref_h = jnp.maximum(adj @ (x @ params["w1"]) + params["b1"], 0.0)
    ref = adj @ (ref_h @ params["w2"]) + params["b2"]
    assert out.shape == (N, NOUT)
    assert jnp.allclose(out, ref, atol=1e-4, rtol=1e-4)

    print("KERNEL_OK")
</pallas_src>

<mosaic_0001>
module attributes {stable_mosaic.version = 11 : i64} {
  func.func @_gcn_fused_kernel(%arg0: memref<16x32xf32, #tpu.memory_space<vmem>>, %arg1: memref<16x16xf32, #tpu.memory_space<vmem>>, %arg2: memref<32x64xf32, #tpu.memory_space<vmem>>, %arg3: memref<1x64xf32, #tpu.memory_space<vmem>>, %arg4: memref<64x768xf32, #tpu.memory_space<vmem>>, %arg5: memref<1x768xf32, #tpu.memory_space<vmem>>, %arg6: memref<16x768xf32, #tpu.memory_space<vmem>>) attributes {dimension_semantics = [], scalar_prefetch = 0 : i64, scratch_operands = 0 : i64, tpu.core_type = #tpu.core_type<tc>} {
    %c0 = arith.constant 0 : index
    %c0_0 = arith.constant 0 : index
    %0 = vector.load %arg1[%c0, %c0_0] : memref<16x16xf32, #tpu.memory_space<vmem>>, vector<16x16xf32>
    %c0_1 = arith.constant 0 : index
    %c0_2 = arith.constant 0 : index
    %1 = vector.load %arg0[%c0_1, %c0_2] : memref<16x32xf32, #tpu.memory_space<vmem>>, vector<16x32xf32>
    %cst = arith.constant dense<0.000000e+00> : vector<16x32xf32>
    %2 = tpu.matmul %0, %1, %cst {dimension_numbers = #tpu.dot_dimension_numbers<[1], [0], [0], [1], [0, 0, 1, 1], [], []>} : vector<16x16xf32>, vector<16x32xf32>, vector<16x32xf32> -> vector<16x32xf32>
    %c0_3 = arith.constant 0 : index
    %c0_4 = arith.constant 0 : index
    %3 = vector.load %arg2[%c0_3, %c0_4] : memref<32x64xf32, #tpu.memory_space<vmem>>, vector<32x64xf32>
    %cst_5 = arith.constant dense<0.000000e+00> : vector<16x64xf32>
    %4 = tpu.matmul %2, %3, %cst_5 {dimension_numbers = #tpu.dot_dimension_numbers<[1], [0], [0], [1], [0, 0, 1, 1], [], []>} : vector<16x32xf32>, vector<32x64xf32>, vector<16x64xf32> -> vector<16x64xf32>
    %c0_6 = arith.constant 0 : index
    %c0_7 = arith.constant 0 : index
    %5 = vector.load %arg3[%c0_6, %c0_7] : memref<1x64xf32, #tpu.memory_space<vmem>>, vector<1x64xf32>
    %6 = vector.broadcast %5 : vector<1x64xf32> to vector<16x64xf32>
    %7 = arith.addf %4, %6 : vector<16x64xf32>
    %cst_8 = arith.constant 0.000000e+00 : f32
    %8 = vector.broadcast %cst_8 : f32 to vector<16x64xf32>
    %9 = arith.maximumf %7, %8 : vector<16x64xf32>
    %cst_9 = arith.constant dense<0.000000e+00> : vector<16x64xf32>
    %10 = tpu.matmul %0, %9, %cst_9 {dimension_numbers = #tpu.dot_dimension_numbers<[1], [0], [0], [1], [0, 0, 1, 1], [], []>} : vector<16x16xf32>, vector<16x64xf32>, vector<16x64xf32> -> vector<16x64xf32>
    %c0_10 = arith.constant 0 : index
    %c0_11 = arith.constant 0 : index
    %11 = vector.load %arg4[%c0_10, %c0_11] : memref<64x768xf32, #tpu.memory_space<vmem>>, vector<64x768xf32>
    %cst_12 = arith.constant dense<0.000000e+00> : vector<16x768xf32>
    %12 = tpu.matmul %10, %11, %cst_12 {dimension_numbers = #tpu.dot_dimension_numbers<[1], [0], [0], [1], [0, 0, 1, 1], [], []>} : vector<16x64xf32>, vector<64x768xf32>, vector<16x768xf32> -> vector<16x768xf32>
    %c0_13 = arith.constant 0 : index
    %c0_14 = arith.constant 0 : index
    %13 = vector.load %arg5[%c0_13, %c0_14] : memref<1x768xf32, #tpu.memory_space<vmem>>, vector<1x768xf32>
    %14 = vector.broadcast %13 : vector<1x768xf32> to vector<16x768xf32>
    %15 = arith.addf %12, %14 : vector<16x768xf32>
    %c0_15 = arith.constant 0 : index
    %c0_16 = arith.constant 0 : index
    %16 = vector.load %arg6[%c0_15, %c0_16] : memref<16x768xf32, #tpu.memory_space<vmem>>, vector<16x768xf32>
    tpu.vector_store %arg6[%c0_15, %c0_16], %15 {strides = array<i32>} : memref<16x768xf32, #tpu.memory_space<vmem>>, vector<16x768xf32>,
    return
  }
}

</mosaic_0001>

<bundles_post_ra>
// kernel: tpu_custom_call.1
= control target key start
LH: loop header
LB: loop body
LE: loop exit
PB: predicated region body
PF: predicated region fallthrough
CT: control target
= control target key end

     0   :  { %11 = vsyncpa [#allocation3], 0  ;;  %s710_s0 = inlined_call_operand.hbm [shape: f32[16,32], index: 0, kind: input, shape index: {}]   ;;  %s711_s1 = inlined_call_operand.hbm [shape: f32[16,16], index: 1, kind: input, shape index: {}]   ;;  %s712_s2 = inlined_call_operand.hbm [shape: f32[32,64], index: 2, kind: input, shape index: {}]   ;;  %s713_s3 = inlined_call_operand.vmem [shape: f32[1,64], index: 3, kind: input, shape index: {}]   ;;  %s714_s4 = inlined_call_operand.hbm [shape: f32[64,768], index: 4, kind: input, shape index: {}]   ;;  %s715_s5 = inlined_call_operand.hbm [shape: f32[1,768], index: 5, kind: input, shape index: {}]   ;;  %s716_s6 = inlined_call_operand.hbm [shape: f32[16,768], index: 6, kind: output, shape index: {}]  }
   0x1   :  { %12 = vsyncpa [#allocation6], 0 }
   0x2   :  { %13 = vsyncpa [#allocation9], 0 }
   0x3   :  { %14 = vsyncpa [#allocation4], 0  ;;  %s32_s23 = sshll.u32 %s711_s1, 4  ;;  %s626_s24 = smov [#allocation5]   ;;  %s33_s23 = int_to_ptr.hbm [resolvable:$true] %s32_s23 }
   0x4   :  { %s34_s25 = sshll.u32 %s626_s24, 4  ;;  %s60_s28 = sshll.u32 %s714_s4, 4  ;;  %s35_s25 = int_to_ptr.vmem [resolvable:$true] %s34_s25  ;;  %s61_s28 = int_to_ptr.hbm [resolvable:$true] %s60_s28 }
   0x5   :  { %s627_s29 = smov 128   ;;  %s628_s30 = smov 8  }
   0x6   :  { %40 = dma.hbm_to_vmem [thread:$0]  %s33_s23, 256, %s35_s25, [#allocation6], %s627_s29, %s627_s29, %s628_s30  }
   0x7   :  { %s629_s7 = smov [#allocation8]   ;;  %s630_s9 = smov 768  }
   0x8   :  { %s62_s8 = sshll.u32 %s629_s7, 4  ;;  %s631_s10 = smov 48   ;;  %s63_s8 = int_to_ptr.vmem [resolvable:$true] %s62_s8 }
   0x9   :  { %68 = dma.hbm_to_vmem [thread:$0]  %s61_s28, 6144, %s63_s8, [#allocation9], %s630_s9, %s630_s9, %s631_s10  }
   0xa   :  { %s19_s12 = sshll.u32 %s710_s0, 4  ;;  %s632_s13 = smov [#allocation2]   ;;  %s20_s12 = int_to_ptr.hbm [resolvable:$true] %s19_s12 }
   0xb   :  { %s21_s4 = sshll.u32 %s632_s13, 4  ;;  %s45_s16 = sshll.u32 %s712_s2, 4  ;;  %s22_s4 = int_to_ptr.vmem [resolvable:$true] %s21_s4  ;;  %s46_s16 = int_to_ptr.hbm [resolvable:$true] %s45_s16 }
   0xc   :  { %27 = dma.hbm_to_vmem [thread:$0]  %s20_s12, 256, %s22_s4, [#allocation3], %s627_s29, %s627_s29, %s628_s30  }
   0xd   :  { %s633_s17 = smov [#allocation7]   ;;  %s74_s21 = sshll.u32 %s715_s5, 4  ;;  %s75_s21 = int_to_ptr.hbm [resolvable:$true] %s74_s21 }
   0xe   :  { %s47_s18 = sshll.u32 %s633_s17, 4  ;;  %s634_s0 = smov [#allocation10]   ;;  %s48_s18 = int_to_ptr.vmem [resolvable:$true] %s47_s18 }
   0xf   :  { %53 = dma.hbm_to_vmem [thread:$0]  %s46_s16, 512, %s48_s18, [#allocation6], %s627_s29, %s627_s29, %s628_s30  }
  0x10   :  { %s76_s22 = sshll.u32 %s634_s0, 4  ;;  %s77_s22 = int_to_ptr.vmem [resolvable:$true] %s76_s22 }
  0x11   :  { %79 = dma.hbm_to_vmem [thread:$0]  %s75_s21, 96, %s77_s22, [#allocation9]  }
  0x12   :  { %618 = dma.done.wait [#allocation3], 256  }
  0x13   :  { %619 = vsyncadd [#allocation3], 4294967040 }
  0x14   :  { %620 = dma.done.wait [#allocation6], 768  }
  0x15   :  { %621 = vsyncadd [#allocation6], 4294966528 }
  0x16   :  { %622 = dma.done.wait [#allocation9], 6240  }
  0x17   :  { %623 = vsyncadd [#allocation9], 4294961056  ;;  %v103_v0 = vld [vmem:[#allocation2 + $0x8] sm:$0xff]  ;;  %v102_v1 = vld [vmem:[#allocation2] sm:$0xff]  ;;  %vm104_vm0 = vcmask 130048   ;;  %vm142_vm1 = vcmask 261120  }
  0x18   :  { %125 = vmatpush.msra.mxu0 %v103_v0  ;;  %v689_v2 = vld [vmem:[#allocation5] sm:$0xff]  ;;  %v137_v3 = vld [vmem:[#allocation7 + $0x18] sm:$0xff]  ;;  %v135_v5 = vld [vmem:[#allocation7 + $0x8] sm:$0xff]  ;;  %vm259_vm2 = vcmask 523264   ;;  %s422_s26 = sshll.u32 %s716_s6, 4  ;;  %s423_s26 = int_to_ptr.hbm [resolvable:$true] %s422_s26 }
  0x19   :  { %v136_v4 = vld [vmem:[#allocation7 + $0x10] sm:$0xff]  ;;  %161 = vmatpush.msra.mxu1 %v137_v3  ;;  %v693_v6 = vld [vmem:[#allocation5 + $0x8] sm:$0xff]  ;;  %v134_v7 = vld [vmem:[#allocation7] sm:$0xff] }
  0x1a   :  { %126 = vmatpush.msra.mxu0 %v102_v1  ;;  %v239_v10 = vld [vmem:[#allocation8 + $0x150] sm:$0xff]  ;;  %v240_v11 = vld [vmem:[#allocation8 + $0x158] sm:$0xff]  ;;  %v242_v12 = vld [vmem:[#allocation8 + $0x168] sm:$0xff] }
  0x1b   :  { %437 = vmatmul.msk.f32.vlgmr.msra.gmra.mxu0 %vm104_vm0, %v689_v2  ;;  %162 = vmatpush.msra.mxu1 %v136_v4  ;;  %v233_v13 = vld [vmem:[#allocation8 + $0x120] sm:$0xff]  ;;  %v234_v14 = vld [vmem:[#allocation8 + $0x128] sm:$0xff]  ;;  %v236_v15 = vld [vmem:[#allocation8 + $0x138] sm:$0xff] }
  0x1c   :  { %274 = vmatpush.msra.mxu3 %v239_v10  ;;  %297 = vmatpush.msrb.mxu0 %v240_v11  ;;  %v227_v16 = vld [vmem:[#allocation8 + $0xf0] sm:$0xff]  ;;  %v228_v17 = vld [vmem:[#allocation8 + $0xf8] sm:$0xff]  ;;  %v230_v18 = vld [vmem:[#allocation8 + $0x108] sm:$0xff] }
  0x1d   :  { %163 = vmatpush.msra.mxu1 %v135_v5  ;;  %v221_v19 = vld [vmem:[#allocation8 + $0xc0] sm:$0xff]  ;;  %v222_v20 = vld [vmem:[#allocation8 + $0xc8] sm:$0xff]  ;;  %v224_v21 = vld [vmem:[#allocation8 + $0xd8] sm:$0xff] }
  0x1e   :  { %275 = vmatpush.msra.mxu3 %v233_v13  ;;  %298 = vmatpush.msrb.mxu0 %v234_v14  ;;  %v215_v22 = vld [vmem:[#allocation8 + $0x90] sm:$0xff]  ;;  %v216_v23 = vld [vmem:[#allocation8 + $0x98] sm:$0xff]  ;;  %v218_v24 = vld [vmem:[#allocation8 + $0xa8] sm:$0xff] }
  0x1f   :  { %164 = vmatpush.msra.mxu1 %v134_v7  ;;  %v209_v26 = vld [vmem:[#allocation8 + $0x60] sm:$0xff]  ;;  %v210_v27 = vld [vmem:[#allocation8 + $0x68] sm:$0xff]  ;;  %v212_v28 = vld [vmem:[#allocation8 + $0x78] sm:$0xff] }
  0x20   :  { %276 = vmatpush.msra.mxu3 %v227_v16  ;;  %299 = vmatpush.msrb.mxu0 %v228_v17  ;;  %v203_v29 = vld [vmem:[#allocation8 + $0x30] sm:$0xff]  ;;  %v204_v30 = vld [vmem:[#allocation8 + $0x38] sm:$0xff]  ;;  %v206_v31 = vld [vmem:[#allocation8 + $0x48] sm:$0xff] }
  0x21   :  { %343 = vmatpush.msrb.mxu1 %v242_v12  ;;  %v473_v32 = vld [vmem:[%s713_s3] ss:$0 sm:$0xff]  ;;  %v235_v39 = vld [vmem:[#allocation8 + $0x130] sm:$0xff]  ;;  %v198_v46 = vld [vmem:[#allocation8 + $0x8] sm:$0xff]  ;;  %s635_s3 = smov [#allocation11]  }
  0x22   :  { %277 = vmatpush.msra.mxu3 %v221_v19  ;;  %300 = vmatpush.msrb.mxu0 %v222_v20  ;;  %v241_v38 = vld [vmem:[#allocation8 + $0x160] sm:$0xff]  ;;  %v223_v41 = vld [vmem:[#allocation8 + $0xd0] sm:$0xff]  ;;  %v200_v48 = vld [vmem:[#allocation8 + $0x18] sm:$0xff]  ;;  %s420_s23 = sshll.u32 %s635_s3, 4  ;;  %s421_s23 = int_to_ptr.vmem [resolvable:$true] %s420_s23 }
  0x23   :  { %438 = vmatmul.msk.f32.gmra.mxu0 %vm104_vm0, %v693_v6  ;;  %344 = vmatpush.msrb.mxu1 %v236_v15  ;;  %v229_v40 = vld [vmem:[#allocation8 + $0x100] sm:$0xff]  ;;  %v211_v43 = vld [vmem:[#allocation8 + $0x70] sm:$0xff]  ;;  %v244_v50 = vld [vmem:[#allocation8 + $0x178] sm:$0xff] }
  0x24   :  { %278 = vmatpush.msra.mxu3 %v215_v22  ;;  %301 = vmatpush.msrb.mxu0 %v216_v23  ;;  %v217_v42 = vld [vmem:[#allocation8 + $0xa0] sm:$0xff]  ;;  %v199_v47 = vld [vmem:[#allocation8 + $0x10] sm:$0xff]  ;;  %v238_v52 = vld [vmem:[#allocation8 + $0x148] sm:$0xff] }
  0x25   :  { %345 = vmatpush.msrb.mxu1 %v230_v18  ;;  %v205_v44 = vld [vmem:[#allocation8 + $0x40] sm:$0xff]  ;;  %v243_v49 = vld [vmem:[#allocation8 + $0x170] sm:$0xff]  ;;  %v232_v54 = vld [vmem:[#allocation8 + $0x118] sm:$0xff] }
  0x26   :  { %279 = vmatpush.msra.mxu3 %v209_v26  ;;  %302 = vmatpush.msrb.mxu0 %v210_v27  ;;  %v197_v45 = vld [vmem:[#allocation8] sm:$0xff]  ;;  %v231_v53 = vld [vmem:[#allocation8 + $0x110] sm:$0xff]  ;;  %v226_v56 = vld [vmem:[#allocation8 + $0xe8] sm:$0xff] }
  0x27   :  { %346 = vmatpush.msrb.mxu1 %v224_v21  ;;  %v237_v51 = vld [vmem:[#allocation8 + $0x140] sm:$0xff]  ;;  %v219_v57 = vld [vmem:[#allocation8 + $0xb0] sm:$0xff]  ;;  %v220_v58 = vld [vmem:[#allocation8 + $0xb8] sm:$0xff] }
  0x28   :  { %280 = vmatpush.msra.mxu3 %v203_v29  ;;  %303 = vmatpush.msrb.mxu0 %v204_v30  ;;  %v225_v55 = vld [vmem:[#allocation8 + $0xe0] sm:$0xff]  ;;  %v214_v60 = vld [vmem:[#allocation8 + $0x88] sm:$0xff]  ;;  %v207_v61 = vld [vmem:[#allocation8 + $0x50] sm:$0xff] }
  0x29   :  { %347 = vmatpush.msrb.mxu1 %v218_v24  ;;  %v213_v59 = vld [vmem:[#allocation8 + $0x80] sm:$0xff]  ;;  %v208_v62 = vld [vmem:[#allocation8 + $0x58] sm:$0xff]  ;;  %v202_v0 = vld [vmem:[#allocation8 + $0x28] sm:$0xff] }
  0x2a   :  { %281 = vmatpush.msra.mxu3 %v197_v45  ;;  %304 = vmatpush.msrb.mxu0 %v198_v46  ;;  %v201_v63 = vld [vmem:[#allocation8 + $0x20] sm:$0xff] }
  0x2b   :  { %348 = vmatpush.msrb.mxu1 %v212_v28  ;;  %v245_v3 = vld [vmem:[#allocation10] sm:$0x3f] }
  0x2c   :  { %366 = vmatpush.msrb.mxu3 %v243_v49  ;;  %389 = vmatpush.msra.mxu0 %v244_v50  ;;  %v248_v4 = vperm.slane %v245_v3, 1  ;;  %v250_v5 = vperm.slane %v245_v3, 3  ;;  %v247_v10 = vperm.slane %v245_v3, 0  ;;  %v249_v11 = vperm.slane %v245_v3, 2 }
  0x2d   :  { %349 = vmatpush.msrb.mxu1 %v206_v31  ;;  %v252_v20 = vperm.slane %v245_v3, 5  ;;  %v251_v27 = vperm.slane %v245_v3, 4 }
  0x2e   :  { %367 = vmatpush.msrb.mxu3 %v237_v51  ;;  %390 = vmatpush.msra.mxu0 %v238_v52 }
  0x2f   :  { %350 = vmatpush.msrb.mxu1 %v200_v48 }
  0x30   :  { %368 = vmatpush.msrb.mxu3 %v231_v53  ;;  %391 = vmatpush.msra.mxu0 %v232_v54 }
  0x32   :  { %369 = vmatpush.msrb.mxu3 %v225_v55  ;;  %392 = vmatpush.msra.mxu0 %v226_v56 }
  0x34   :  { %370 = vmatpush.msrb.mxu3 %v219_v57  ;;  %393 = vmatpush.msra.mxu0 %v220_v58 }
  0x36   :  { %371 = vmatpush.msrb.mxu3 %v213_v59  ;;  %394 = vmatpush.msra.mxu0 %v214_v60 }
  0x38   :  { %372 = vmatpush.msrb.mxu3 %v207_v61  ;;  %395 = vmatpush.msra.mxu0 %v208_v62 }
  0x3a   :  { %373 = vmatpush.msrb.mxu3 %v201_v63  ;;  %396 = vmatpush.msra.mxu0 %v202_v0 }
  0x98   :  { %v128_v8 = vpop.f32.mrf.mxu0 }
  0x99   :  { %439 = vmatmul.msk.f32.vlgmr.msra.gmra.mxu1 %vm142_vm1, %v128_v8 }
  0xa0   :  { %v131_v9 = vpop.f32.mrf.mxu0 }
  0xa1   :  { %440 = vmatmul.msk.f32.gmra.mxu1 %vm142_vm1, %v131_v9 }
 0x116   :  { %v166_v25 = vpop.f32.mrf.mxu1 }
 0x117   :  { %v167_v34 = vadd.f32 %v473_v32, %v166_v25 }
 0x119   :  { %v172_v37 = vmax.f32 %v167_v34, 0.0 }
 0x11e   :  { %v169_v33 = vpop.f32.mrf.mxu1 }
 0x11f   :  { %v170_v35 = vadd.f32 %v473_v32, %v169_v33 }
 0x121   :  { %v173_v36 = vmax.f32 %v170_v35, 0.0 }
 0x123   :  { %188 = vmatpush.msra.mxu2 %v173_v36 }
 0x125   :  { %189 = vmatpush.msra.mxu2 %v172_v37 }
 0x126   :  { %441 = vmatmul.msk.f32.vlgmr.msra.gmra.mxu2 %vm104_vm0, %v689_v2 }
 0x127   :  { %320 = vmatpush.msrb.mxu2 %v241_v38 }
 0x129   :  { %321 = vmatpush.msrb.mxu2 %v235_v39 }
 0x12b   :  { %322 = vmatpush.msrb.mxu2 %v229_v40 }
 0x12d   :  { %323 = vmatpush.msrb.mxu2 %v223_v41 }
 0x12e   :  { %442 = vmatmul.msk.f32.gmra.mxu2 %vm104_vm0, %v693_v6 }
 0x12f   :  { %324 = vmatpush.msrb.mxu2 %v217_v42 }
 0x131   :  { %325 = vmatpush.msrb.mxu2 %v211_v43 }
 0x133   :  { %326 = vmatpush.msrb.mxu2 %v205_v44 }
 0x135   :  { %327 = vmatpush.msrb.mxu2 %v199_v47 }
 0x137   :  { %455 = vmatpush.msra.mxu2 %v244_v50 }
 0x139   :  { %456 = vmatpush.msra.mxu2 %v238_v52 }
 0x13b   :  { %457 = vmatpush.msra.mxu2 %v232_v54 }
 0x13d   :  { %458 = vmatpush.msra.mxu2 %v226_v56 }
 0x13f   :  { %459 = vmatpush.msra.mxu2 %v220_v58 }
 0x141   :  { %460 = vmatpush.msra.mxu2 %v214_v60 }
 0x143   :  { %461 = vmatpush.msra.mxu2 %v208_v62 }
 0x145   :  { %462 = vmatpush.msra.mxu2 %v202_v0 }
 0x1a9   :  { %v191_v1 = vpop.f32.mrf.mxu2 }
 0x1aa   :  { %443 = vmatmul.msk.f32.vlgmr.msra.gmra.mxu3 %vm259_vm2, %v191_v1  ;;  %445 = vmatmul.msk.f32.vlgmr.msrb.gmra.mxu0 %vm259_vm2, %v191_v1 }
 0x1ab   :  { %447 = vmatmul.msk.f32.vlgmr.msrb.gmra.mxu2 %vm259_vm2, %v191_v1  ;;  %449 = vmatmul.msk.f32.vlgmr.msrb.gmra.mxu1 %vm259_vm2, %v191_v1 }
 0x1b1   :  { %v194_v2 = vpop.f32.mrf.mxu2 }
 0x1b2   :  { %444 = vmatmul.msk.f32.gmra.mxu3 %vm259_vm2, %v194_v2  ;;  %446 = vmatmul.msk.f32.gmra.mxu0 %vm259_vm2, %v194_v2 }
 0x1b3   :  { %448 = vmatmul.msk.f32.gmra.mxu2 %vm259_vm2, %v194_v2  ;;  %450 = vmatmul.msk.f32.gmra.mxu1 %vm259_vm2, %v194_v2 }
 0x1ba   :  { %451 = vmatmul.msk.f32.vlgmr.msrb.gmra.mxu3 %vm259_vm2, %v191_v1  ;;  %453 = vmatmul.msk.f32.vlgmr.msra.gmra.mxu0 %vm259_vm2, %v191_v1 }
 0x1bb   :  { %454 = vmatmul.msk.f32.vlgmr.msra.gmra.mxu2 %vm259_vm2, %v194_v2 }
 0x1c2   :  { %452 = vmatmul.msk.f32.gmra.mxu3 %vm259_vm2, %v194_v2 }
 0x227   :  { %v306_v6 = vpop.f32.mrf.mxu0 }
 0x228   :  { %v307_v7 = vadd.f32 %v306_v6, %v248_v4  ;;  %v352_v8 = vpop.f32.mrf.mxu1 }
 0x229   :  { %v353_v9 = vadd.f32 %v352_v8, %v250_v5 }
 0x22a   :  { %405 = vst [vmem:[#allocation11 + $0x8] sm:$0xff] %v307_v7 }
 0x22b   :  { %407 = vst [vmem:[#allocation11 + $0x18] sm:$0xff] %v353_v9 }
 0x22d   :  { %v283_v12 = vpop.f32.mrf.mxu3 }
 0x22e   :  { %v284_v13 = vadd.f32 %v283_v12, %v247_v10  ;;  %v329_v14 = vpop.f32.mrf.mxu2 }
 0x22f   :  { %v330_v15 = vadd.f32 %v329_v14, %v249_v11  ;;  %v309_v16 = vpop.f32.mrf.mxu0 }
 0x230   :  { %404 = vst [vmem:[#allocation11] sm:$0xff] %v284_v13  ;;  %v310_v17 = vadd.f32 %v309_v16, %v248_v4  ;;  %v355_v18 = vpop.f32.mrf.mxu1 }
 0x231   :  { %406 = vst [vmem:[#allocation11 + $0x10] sm:$0xff] %v330_v15  ;;  %v356_v19 = vadd.f32 %v355_v18, %v250_v5 }
 0x232   :  { %411 = vst [vmem:[#allocation11 + $0x38] sm:$0xff] %v310_v17 }
 0x233   :  { %413 = vst [vmem:[#allocation11 + $0x48] sm:$0xff] %v356_v19 }
 0x235   :  { %v286_v21 = vpop.f32.mrf.mxu3 }
 0x236   :  { %v287_v22 = vadd.f32 %v286_v21, %v247_v10  ;;  %v332_v23 = vpop.f32.mrf.mxu2 }
 0x237   :  { %v333_v24 = vadd.f32 %v332_v23, %v249_v11  ;;  %v398_v25 = vpop.f32.mrf.mxu0 }
 0x238   :  { %410 = vst [vmem:[#allocation11 + $0x30] sm:$0xff] %v287_v22  ;;  %v399_v26 = vadd.f32 %v398_v25, %v252_v20 }
 0x239   :  { %412 = vst [vmem:[#allocation11 + $0x40] sm:$0xff] %v333_v24 }
 0x23a   :  { %409 = vst [vmem:[#allocation11 + $0x28] sm:$0xff] %v399_v26 }
 0x23d   :  { %v375_v28 = vpop.f32.mrf.mxu3 }
 0x23e   :  { %v376_v29 = vadd.f32 %v375_v28, %v251_v27  ;;  %v401_v30 = vpop.f32.mrf.mxu2 }
 0x23f   :  { %v402_v31 = vadd.f32 %v401_v30, %v252_v20 }
 0x240   :  { %408 = vst [vmem:[#allocation11 + $0x20] sm:$0xff] %v376_v29 }
 0x241   :  { %415 = vst [vmem:[#allocation11 + $0x58] sm:$0xff] %v402_v31 }
 0x245   :  { %v378_v32 = vpop.f32.mrf.mxu3 }
 0x246   :  { %v379_v33 = vadd.f32 %v378_v32, %v251_v27 }
 0x248   :  { %414 = vst [vmem:[#allocation11 + $0x50] sm:$0xff] %v379_v33 }
 0x249   :  { %428 = dma.vmem_to_hbm [thread:$0]  %s421_s23, 1536, %s423_s26, [#allocation4], %s630_s9, %s630_s9, %s631_s10  }
 0x24a   :  { %624 = dma.done.wait [#allocation4], 1536  }
 0x24b   :  { %625 = vsyncadd [#allocation4], 4294965760 }
 0x24c   :  { %433 = vsyncpa [#allocation3], 1 }
 0x24d   :  { %434 = vsyncpa [#allocation6], 1 }
 0x24e   :  { %435 = vsyncpa [#allocation9], 1 }
 0x24f   :  { %436 = vsyncpa [#allocation4], 1 }

</bundles_post_ra>
